<compile_context>
chip_gen: v5e
topology: v5e:2x2
jax: 0.10.0
libtpu: 0.0.40
codegen_flags: <defaults>
</compile_context>

<pallas_src>
import functools

import jax
import jax.numpy as jnp
from jax.experimental import pallas as pl
from jax.experimental.pallas import tpu as pltpu

IN_DIM, HIDDEN, OUT_DIM = 20, 256, 10
OUT_PAD = 128          # lane-dense output width (multiple of 128)
BLOCK_M = 256          # batch tile: MXU-shaped row count for large batches


def mlp_kernel(x_ref, w1_ref, b1_ref, w2_ref, b2_ref, o_ref):
    # Layer 1: (tm, 20) @ (20, 256) on the MXU — bf16 inputs, f32 accumulate.
    # TODO(synk): K=20 mostly pads the MXU; a VPU broadcast-MAC would avoid
    # that if this exact shape were the real workload.
    x = x_ref[...].astype(jnp.bfloat16)
    h = jnp.dot(x, w1_ref[...], preferred_element_type=jnp.float32)
    # Bias + ReLU in f32 (keeps the elementwise path native on v5e).
    h = jnp.maximum(h + b1_ref[...], 0.0)
    # Layer 2: (tm, 256) @ (256, 128); output width padded to 128 so the store
    # is a full-width vst instead of a masked vst.msk.
    out = jnp.dot(h.astype(jnp.bfloat16), w2_ref[...],
                  preferred_element_type=jnp.float32)
    out = out + b2_ref[...]
    o_ref[...] = out.astype(o_ref.dtype)


@functools.partial(jax.jit, static_argnames=("block_m",))
def my_sequential(x, w1, b1, w2, b2, *, block_m=BLOCK_M):
    """x:(B,20) f32, w1:(20,256), b1:(1,256), w2:(256,10), b2:(1,10) -> (B,10)."""
    B = x.shape[0]
    tm = block_m if B >= block_m else B      # full-extent block for tiny B
    grid = (pl.cdiv(B, tm),)

    # One-time (jit-fused) prep: bf16 MXU weights + lane-dense padded layer 2.
    w1b = w1.astype(jnp.bfloat16)
    w2p = jnp.zeros((HIDDEN, OUT_PAD), jnp.bfloat16).at[:, :OUT_DIM].set(
        w2.astype(jnp.bfloat16))
    b2p = jnp.zeros((1, OUT_PAD), jnp.float32).at[:, :OUT_DIM].set(
        b2.astype(jnp.float32))

    out_padded = pl.pallas_call(
        mlp_kernel,
        out_shape=jax.ShapeDtypeStruct((B, OUT_PAD), x.dtype),
        grid=grid,
        in_specs=[
            pl.BlockSpec((tm, IN_DIM), lambda i: (i, 0)),        # x: tiled over batch
            pl.BlockSpec((IN_DIM, HIDDEN), lambda i: (0, 0)),    # W1: VMEM-resident
            pl.BlockSpec((1, HIDDEN), lambda i: (0, 0)),         # b1: VMEM-resident
            pl.BlockSpec((HIDDEN, OUT_PAD), lambda i: (0, 0)),   # W2 (padded)
            pl.BlockSpec((1, OUT_PAD), lambda i: (0, 0)),        # b2 (padded)
        ],
        out_specs=pl.BlockSpec((tm, OUT_PAD), lambda i: (i, 0)),
        compiler_params=pltpu.CompilerParams(
            dimension_semantics=("parallel",)),                  # megacore on v7x
    )(x, w1b, b1, w2p, b2p)
    return out_padded[:, :OUT_DIM]


def init_params(key):
    # PyTorch-style uniform(-1/sqrt(fan_in), 1/sqrt(fan_in)) init.
    k1, k2, k3, k4 = jax.random.split(key, 4)
    bound1 = 1.0 / jnp.sqrt(IN_DIM)
    bound2 = 1.0 / jnp.sqrt(HIDDEN)
    w1 = jax.random.uniform(k1, (IN_DIM, HIDDEN), jnp.float32, -bound1, bound1)
    b1 = jax.random.uniform(k2, (1, HIDDEN), jnp.float32, -bound1, bound1)
    w2 = jax.random.uniform(k3, (HIDDEN, OUT_DIM), jnp.float32, -bound2, bound2)
    b2 = jax.random.uniform(k4, (1, OUT_DIM), jnp.float32, -bound2, bound2)
    return w1, b1, w2, b2


if __name__ == "__main__":
    key = jax.random.PRNGKey(0)
    kx, kp = jax.random.split(key)
    batch = 2
    x = jax.random.uniform(kx, (batch, IN_DIM), jnp.float32)
    w1, b1, w2, b2 = init_params(kp)

    out = my_sequential(x, w1, b1, w2, b2)
    jax.block_until_ready(out)
    assert out.shape == (batch, OUT_DIM)

    # Reference with identical precision policy (bf16 MXU inputs, f32 accum).
    xb = x.astype(jnp.bfloat16)
    w1b = w1.astype(jnp.bfloat16)
    h_ref = jnp.maximum(
        jnp.dot(xb, w1b, preferred_element_type=jnp.float32) + b1, 0.0)
    ref = jnp.dot(h_ref.astype(jnp.bfloat16), w2.astype(jnp.bfloat16),
                  preferred_element_type=jnp.float32) + b2
    assert jnp.allclose(out, ref, atol=1e-2, rtol=1e-2), (
        float(jnp.max(jnp.abs(out - ref))))

    print("KERNEL_OK")
</pallas_src>

<mosaic_0001>
module attributes {stable_mosaic.version = 11 : i64} {
  func.func @mlp_kernel(%arg0: i32, %arg1: memref<2x20xf32, #tpu.memory_space<vmem>>, %arg2: memref<20x256xbf16, #tpu.memory_space<vmem>>, %arg3: memref<1x256xf32, #tpu.memory_space<vmem>>, %arg4: memref<256x128xbf16, #tpu.memory_space<vmem>>, %arg5: memref<1x128xf32, #tpu.memory_space<vmem>>, %arg6: memref<2x128xf32, #tpu.memory_space<vmem>>) attributes {dimension_semantics = [#tpu.dimension_semantics<parallel>], iteration_bounds = array<i64: 1>, scalar_prefetch = 0 : i64, scratch_operands = 0 : i64, tpu.core_type = #tpu.core_type<tc>, window_params = [{transform_indices = @transform_0, window_bounds = array<i64: 2, 20>}, {pipeline_mode = #tpu.pipeline_mode<synchronous>, transform_indices = @transform_1, window_bounds = array<i64: 20, 256>}, {pipeline_mode = #tpu.pipeline_mode<synchronous>, transform_indices = @transform_2, window_bounds = array<i64: 1, 256>}, {pipeline_mode = #tpu.pipeline_mode<synchronous>, transform_indices = @transform_3, window_bounds = array<i64: 256, 128>}, {pipeline_mode = #tpu.pipeline_mode<synchronous>, transform_indices = @transform_4, window_bounds = array<i64: 1, 128>}, {transform_indices = @transform_5, window_bounds = array<i64: 2, 128>}]} {
    %c0 = arith.constant 0 : index
    %c0_0 = arith.constant 0 : index
    %0 = vector.load %arg1[%c0, %c0_0] : memref<2x20xf32, #tpu.memory_space<vmem>>, vector<2x20xf32>
    %1 = arith.truncf %0 : vector<2x20xf32> to vector<2x20xbf16>
    %c0_1 = arith.constant 0 : index
    %c0_2 = arith.constant 0 : index
    %2 = vector.load %arg2[%c0_1, %c0_2] : memref<20x256xbf16, #tpu.memory_space<vmem>>, vector<20x256xbf16>
    %cst = arith.constant dense<0.000000e+00> : vector<2x256xf32>
    %3 = tpu.matmul %1, %2, %cst {dimension_numbers = #tpu.dot_dimension_numbers<[1], [0], [0], [1], [0, 0, 1, 1], [], []>} : vector<2x20xbf16>, vector<20x256xbf16>, vector<2x256xf32> -> vector<2x256xf32>
    %c0_3 = arith.constant 0 : index
    %c0_4 = arith.constant 0 : index
    %4 = vector.load %arg3[%c0_3, %c0_4] : memref<1x256xf32, #tpu.memory_space<vmem>>, vector<1x256xf32>
    %5 = vector.broadcast %4 : vector<1x256xf32> to vector<2x256xf32>
    %6 = arith.addf %3, %5 : vector<2x256xf32>
    %cst_5 = arith.constant 0.000000e+00 : f32
    %7 = vector.broadcast %cst_5 : f32 to vector<2x256xf32>
    %8 = arith.maximumf %6, %7 : vector<2x256xf32>
    %9 = arith.truncf %8 : vector<2x256xf32> to vector<2x256xbf16>
    %c0_6 = arith.constant 0 : index
    %c0_7 = arith.constant 0 : index
    %10 = vector.load %arg4[%c0_6, %c0_7] : memref<256x128xbf16, #tpu.memory_space<vmem>>, vector<256x128xbf16>
    %cst_8 = arith.constant dense<0.000000e+00> : vector<2x128xf32>
    %11 = tpu.matmul %9, %10, %cst_8 {dimension_numbers = #tpu.dot_dimension_numbers<[1], [0], [0], [1], [0, 0, 1, 1], [], []>} : vector<2x256xbf16>, vector<256x128xbf16>, vector<2x128xf32> -> vector<2x128xf32>
    %c0_9 = arith.constant 0 : index
    %c0_10 = arith.constant 0 : index
    %12 = vector.load %arg5[%c0_9, %c0_10] : memref<1x128xf32, #tpu.memory_space<vmem>>, vector<1x128xf32>
    %13 = vector.broadcast %12 : vector<1x128xf32> to vector<2x128xf32>
    %14 = arith.addf %11, %13 : vector<2x128xf32>
    %c0_11 = arith.constant 0 : index
    %c0_12 = arith.constant 0 : index
    %15 = vector.load %arg6[%c0_11, %c0_12] : memref<2x128xf32, #tpu.memory_space<vmem>>, vector<2x128xf32>
    tpu.vector_store %arg6[%c0_11, %c0_12], %14 {strides = array<i32>} : memref<2x128xf32, #tpu.memory_space<vmem>>, vector<2x128xf32>,
    return
  }
  func.func @transform_0(%arg0: i32) -> (i32, i32) {
    %c0_i32 = arith.constant 0 : i32
    %c0_i32_0 = arith.constant 0 : i32
    return %arg0, %c0_i32 : i32, i32
  }
  func.func @transform_1(%arg0: i32) -> (i32, i32) {
    %c0_i32 = arith.constant 0 : i32
    %c0_i32_0 = arith.constant 0 : i32
    %c0_i32_1 = arith.constant 0 : i32
    return %c0_i32, %c0_i32_0 : i32, i32
  }
  func.func @transform_2(%arg0: i32) -> (i32, i32) {
    %c0_i32 = arith.constant 0 : i32
    %c0_i32_0 = arith.constant 0 : i32
    %c0_i32_1 = arith.constant 0 : i32
    return %c0_i32, %c0_i32_0 : i32, i32
  }
  func.func @transform_3(%arg0: i32) -> (i32, i32) {
    %c0_i32 = arith.constant 0 : i32
    %c0_i32_0 = arith.constant 0 : i32
    %c0_i32_1 = arith.constant 0 : i32
    return %c0_i32, %c0_i32_0 : i32, i32
  }
  func.func @transform_4(%arg0: i32) -> (i32, i32) {
    %c0_i32 = arith.constant 0 : i32
    %c0_i32_0 = arith.constant 0 : i32
    %c0_i32_1 = arith.constant 0 : i32
    return %c0_i32, %c0_i32_0 : i32, i32
  }
  func.func @transform_5(%arg0: i32) -> (i32, i32) {
    %c0_i32 = arith.constant 0 : i32
    %c0_i32_0 = arith.constant 0 : i32
    return %arg0, %c0_i32 : i32, i32
  }
}

</mosaic_0001>

<bundles_post_ra>
// kernel: my_sequential.1
= control target key start
LH: loop header
LB: loop body
LE: loop exit
PB: predicated region body
PF: predicated region fallthrough
CT: control target
= control target key end

     0   :  { %vm52_vm0 = vcmask 1041408   ;;  %s490_s0 = inlined_call_operand.vmem [shape: f32[2,20], index: 0, kind: input, shape index: {}]   ;;  %s491_s1 = inlined_call_operand.vmem [shape: bf16[20,256], index: 1, kind: input, shape index: {}]   ;;  %s492_s2 = inlined_call_operand.vmem [shape: f32[1,256], index: 2, kind: input, shape index: {}]   ;;  %s493_s3 = inlined_call_operand.vmem [shape: bf16[256,128], index: 3, kind: input, shape index: {}]   ;;  %s494_s4 = inlined_call_operand.vmem [shape: f32[1,128], index: 4, kind: input, shape index: {}]   ;;  %s495_s5 = inlined_call_operand.hbm [shape: f32[2,128], index: 5, kind: output, shape index: {}]  }
   0x1   :  { %v26_v0 = vld [vmem:[%s491_s1 + $0x10] sm:$0x33]  ;;  %v266_v3 = vld [vmem:[%s491_s1] sm:$0xf]  ;;  %v347_v4 = vld [vmem:[%s493_s3 + $0x38] sm:$0xff] }
   0x2   :  { %v40_v1 = vunpack.c.l.b16 %v26_v0  ;;  %v41_v2 = vunpack.c.h.b16 %v26_v0  ;;  %v355_v5 = vld [vmem:[%s493_s3 + $0x78] sm:$0xff]  ;;  %v339_v8 = vld [vmem:[%s491_s1 + $0x4] sm:$0xf0]  ;;  %v338_v9 = vld [vmem:[%s491_s1 + $0x4] sm:$0xf]  ;;  %221 = vmatpush.bf16.msra.mxu2 %v347_v4 }
   0x3   :  { %v268_v10 = vld [vmem:[%s491_s1 + $0x8] sm:$0xf0]  ;;  %234 = vmatpush.bf16.msra.mxu3 %v355_v5  ;;  %v346_v11 = vld [vmem:[%s493_s3 + $0x30] sm:$0xff]  ;;  %v267_v15 = vor.u32 %v339_v8, %v266_v3  ;;  %v22_v17 = vld [vmem:[%s490_s0] sm:$0x3] }
   0x4   :  { %v44_v6 = vpack.c.b16 %v40_v1, %v40_v1  ;;  %v45_v7 = vpack.c.b16 %v41_v2, %v41_v2  ;;  %v354_v12 = vld [vmem:[%s493_s3 + $0x70] sm:$0xff]  ;;  %v271_v16 = vor.u32 %v338_v9, %v268_v10 }
   0x6   :  { %v54_v13 = vsel %vm52_vm0, %v44_v6, 0  ;;  %v57_v14 = vsel %vm52_vm0, %v45_v7, 0 }
   0x7   :  { %65 = vmatpush.bf16.msra.mxu0 %v54_v13  ;;  %78 = vmatpush.bf16.msra.mxu1 %v57_v14 }
   0x8   :  { %10 = vsyncpa [#allocation3], 0  ;;  %222 = vmatpush.bf16.msra.mxu2 %v346_v11  ;;  %235 = vmatpush.bf16.msra.mxu3 %v354_v12  ;;  %v345_v18 = vld [vmem:[%s493_s3 + $0x28] sm:$0xff]  ;;  %v23_v20 = vpack.c.bf16 %v22_v17, %v22_v17  ;;  %vm48_vm1 = vcmask 162816   ;;  %v344_v21 = vld [vmem:[%s493_s3 + $0x20] sm:$0xff]  ;;  %s255_s15 = sshll.u32 %s495_s5, 4  ;;  %s256_s15 = int_to_ptr.hbm [resolvable:$true] %s255_s15 }
   0x9   :  { %v353_v19 = vld [vmem:[%s493_s3 + $0x68] sm:$0xff]  ;;  %v352_v22 = vld [vmem:[%s493_s3 + $0x60] sm:$0xff]  ;;  %v343_v23 = vld [vmem:[%s493_s3 + $0x18] sm:$0xff] }
   0xa   :  { %v351_v24 = vld [vmem:[%s493_s3 + $0x58] sm:$0xff]  ;;  %v342_v25 = vld [vmem:[%s493_s3 + $0x10] sm:$0xff]  ;;  %v341_v27 = vld [vmem:[%s493_s3 + $0x8] sm:$0xff] }
   0xb   :  { %66 = vmatpush.bf16.msra.mxu0 %v267_v15  ;;  %79 = vmatpush.bf16.msra.mxu1 %v271_v16  ;;  %v350_v26 = vld [vmem:[%s493_s3 + $0x50] sm:$0xff]  ;;  %v349_v28 = vld [vmem:[%s493_s3 + $0x48] sm:$0xff]  ;;  %v340_v29 = vld [vmem:[%s493_s3] sm:$0xff] }
   0xc   :  { %223 = vmatpush.bf16.msra.mxu2 %v345_v18  ;;  %236 = vmatpush.bf16.msra.mxu3 %v353_v19  ;;  %v348_v30 = vld [vmem:[%s493_s3 + $0x40] sm:$0xff] }
   0xd   :  { %v27_v31 = vld [vmem:[%s492_s2] sm:$0x3]  ;;  %s384_s2 = smov [#allocation2]  }
   0xe   :  { %272 = vmatmul.msk.bf16.vlgmr.msra.gmra.mxu0 %vm48_vm1, %v23_v20  ;;  %273 = vmatmul.msk.bf16.vlgmr.msra.gmra.mxu1 %vm48_vm1, %v23_v20  ;;  %v29_v32 = vperm.slane %v27_v31, 0  ;;  %v30_v33 = vperm.slane %v27_v31, 1  ;;  %v357_v44 = vld [vmem:[%s494_s4] ss:$0 sm:$0xff]  ;;  %s253_s1 = sshll.u32 %s384_s2, 4  ;;  %s254_s1 = int_to_ptr.vmem [resolvable:$true] %s253_s1 }
  0x10   :  { %224 = vmatpush.bf16.msra.mxu2 %v344_v21  ;;  %237 = vmatpush.bf16.msra.mxu3 %v352_v22 }
  0x14   :  { %225 = vmatpush.bf16.msra.mxu2 %v343_v23  ;;  %238 = vmatpush.bf16.msra.mxu3 %v351_v24 }
  0x18   :  { %226 = vmatpush.bf16.msra.mxu2 %v342_v25  ;;  %239 = vmatpush.bf16.msra.mxu3 %v350_v26 }
  0x1c   :  { %227 = vmatpush.bf16.msra.mxu2 %v341_v27  ;;  %240 = vmatpush.bf16.msra.mxu3 %v349_v28 }
  0x20   :  { %228 = vmatpush.bf16.msra.mxu2 %v340_v29  ;;  %241 = vmatpush.bf16.msra.mxu3 %v348_v30 }
  0x8b   :  { %v68_v34 = vpop.f32.mrf.mxu0  ;;  %v81_v35 = vpop.f32.mrf.mxu1 }
  0x8c   :  { %v69_v36 = vadd.f32 %v68_v34, %v29_v32  ;;  %v82_v37 = vadd.f32 %v81_v35, %v30_v33 }
  0x8e   :  { %v85_v38 = vmax.f32 %v69_v36, 0.0  ;;  %v86_v39 = vmax.f32 %v82_v37, 0.0 }
  0x90   :  { %v87_v40 = vpack.c.bf16 %v85_v38, %v85_v38  ;;  %v88_v41 = vpack.c.bf16 %v86_v39, %v86_v39 }
  0x92   :  { %229 = vmatmul.bf16.vlgmr.msra.gmra.mxu2 %v87_v40  ;;  %242 = vmatmul.bf16.vlgmr.msra.gmra.mxu3 %v88_v41 }
  0x93   :  { %v70_v42 = vpop.f32.mrf.mxu0  ;;  %v83_v43 = vpop.f32.mrf.mxu1 }
 0x115   :  { %v230_v45 = vpop.f32.mrf.mxu2  ;;  %v243_v46 = vpop.f32.mrf.mxu3 }
 0x116   :  { %v231_v47 = vadd.f32 %v357_v44, %v230_v45 }
 0x118   :  { %v244_v48 = vadd.f32 %v243_v46, %v231_v47 }
 0x11a   :  { %247 = vst [vmem:[#allocation2] sm:$0x3] %v244_v48 }
 0x11b   :  { %258 = dma.vmem_to_hbm [thread:$0]  %s254_s1, 32, %s256_s15, [#allocation3]  }
 0x11d   :  { %v232_v49 = vpop.f32.mrf.mxu2  ;;  %v245_v50 = vpop.f32.mrf.mxu3 }
 0x11e   :  { %382 = dma.done.wait [#allocation3], 32  }
 0x11f   :  { %383 = vsyncadd [#allocation3], 4294967264 }
 0x120   :  { %263 = vsyncpa [#allocation3], 1 }

</bundles_post_ra>
